<compile_context>
chip_gen: v7x
topology: tpu7x:2x2x1
jax: 0.10.0
libtpu: 0.0.40
codegen_flags: <defaults>
</compile_context>

<pallas_src>
import functools
import math

import jax
import jax.numpy as jnp
from jax.experimental import pallas as pl
from jax.experimental.pallas import tpu as pltpu

LANES = 128     # vreg lane width
SUBLANES = 8    # vreg sublane count (f32)
ROW_ALIGN = 32  # row-tile multiple: layout-safe for f32 / bf16 / int8 / bool blocks


def _round_up(x, m):
    return ((x + m - 1) // m) * m


def _device_tuning():
    """Return (num_tensorcores, max_tile_rows) for the local TPU generation."""
    try:
        kind = jax.devices()[0].device_kind.lower()
    except Exception:
        kind = ""
    if "v7" in kind:                       # 2 TCs/chip, ~1.6 TB/s per TC
        return 2, 4096
    if "v6" in kind:                       # single TC, ~86% roofline @ 1-2K rows
        return 1, 2048
    if "v5p" in kind or "v4" in kind:      # megacore: 2 TCs/chip
        return 2, 2048
    return 1, 1024                         # v5e / unknown: 16 MiB scoped VMEM


def _masked_sums_kernel(o_ref, d_ref, m_ref, err_ref, cnt_ref, *,
                        rows, cols, tile_rows, tiles_per_core, full_col_tiles):
    c = pl.program_id(0)   # core / parallel axis
    t = pl.program_id(1)   # row-tile reduction axis
    w = pl.program_id(2)   # col-tile reduction axis

    # (8, 128) accumulator output blocks are VMEM-resident across (t, w):
    # init on the first reduction step of this core.
    @pl.when(jnp.logical_and(t == 0, w == 0))
    def _init():
        err_ref[...] = jnp.zeros_like(err_ref)
        cnt_ref[...] = jnp.zeros_like(cnt_ref)

    # Stream native dtypes, convert in-register.
    o = o_ref[...].astype(jnp.float32)
    d = d_ref[...].astype(jnp.float32)
    mf = m_ref[...].astype(jnp.float32)
    diff = o - d

    # Logical first row of this tile (UNclamped): may exceed `rows` for the
    # clamped/duplicate tiles of the second core or overhang on the last tile.
    row_start = (c * tiles_per_core + t) * tile_rows
    fully_valid = jnp.logical_and(row_start + tile_rows <= rows,
                                  w < full_col_tiles)
    groups = tile_rows // SUBLANES

    @pl.when(fully_valid)
    def _fast():
        # Interior tiles: no iota, no select — pure VPU.
        e = diff * diff * mf
        err_ref[...] += e.reshape(groups, SUBLANES, LANES).sum(axis=0)
        cnt_ref[...] += mf.reshape(groups, SUBLANES, LANES).sum(axis=0)

    @pl.when(jnp.logical_not(fully_valid))
    def _slow():
        # Boundary / clamped tiles: mask invalid rows and lanes.  The selects
        # also block NaN/Inf garbage from out-of-bounds block regions.
        row_ids = jax.lax.broadcasted_iota(jnp.int32, (tile_rows, LANES), 0) + row_start
        col_ids = jax.lax.broadcasted_iota(jnp.int32, (tile_rows, LANES), 1) + w * LANES
        valid = jnp.logical_and(row_ids < rows, col_ids < cols)
        e = jnp.where(valid, diff * diff * mf, 0.0)
        cf = jnp.where(valid, mf, 0.0)
        err_ref[...] += e.reshape(groups, SUBLANES, LANES).sum(axis=0)
        cnt_ref[...] += cf.reshape(groups, SUBLANES, LANES).sum(axis=0)


def custom_loss(output, depth, mask, *, max_tile_rows=None, num_cores=None):
    """RMSE over masked elements, matching CustomLoss.forward.

    Note: if mask.sum() == 0 this returns NaN/Inf, same as the PyTorch module.
    """
    if output.size == 0:
        z = jnp.zeros((), jnp.float32)
        return jnp.sqrt(z / z)

    # Collapse only the LEADING dims -> always a bitcast (no HBM relayout),
    # unlike a flatten to (numel/128, 128) which relayouts when W % 128 != 0.
    if output.ndim < 2:
        shape2d = (1, int(output.size))
    else:
        shape2d = (math.prod(output.shape[:-1]), output.shape[-1])
    o2 = output.reshape(shape2d)
    d2 = depth.reshape(shape2d)
    m2 = mask.reshape(shape2d)
    rows, cols = shape2d

    dev_cores, dev_rows = _device_tuning()
    if max_tile_rows is None:
        max_tile_rows = dev_rows
    if num_cores is None:
        num_cores = dev_cores

    tile_rows = min(_round_up(max_tile_rows, ROW_ALIGN), _round_up(rows, ROW_ALIGN))
    row_tiles = pl.cdiv(rows, tile_rows)
    col_tiles = pl.cdiv(cols, LANES)
    full_col_tiles = cols // LANES
    if row_tiles < num_cores:
        num_cores = 1
    tiles_per_core = pl.cdiv(row_tiles, num_cores)

    def in_map(c, t, w):
        # Clamp so every block index is in bounds; the kernel's row mask
        # zeroes the contribution of clamped (duplicate) tiles.
        return (jnp.minimum(c * tiles_per_core + t, row_tiles - 1), w)

    in_spec = pl.BlockSpec((tile_rows, LANES), in_map)
    out_spec = pl.BlockSpec((SUBLANES, LANES), lambda c, t, w: (c, 0))

    kernel = functools.partial(
        _masked_sums_kernel,
        rows=rows, cols=cols, tile_rows=tile_rows,
        tiles_per_core=tiles_per_core, full_col_tiles=full_col_tiles)

    numel = rows * cols
    cost = pl.CostEstimate(
        flops=5 * numel,
        transcendentals=0,
        bytes_accessed=numel * (o2.dtype.itemsize + d2.dtype.itemsize
                                + m2.dtype.itemsize)
        + 2 * num_cores * SUBLANES * LANES * 4)

    err_p, cnt_p = pl.pallas_call(
        kernel,
        out_shape=(
            jax.ShapeDtypeStruct((num_cores * SUBLANES, LANES), jnp.float32),
            jax.ShapeDtypeStruct((num_cores * SUBLANES, LANES), jnp.float32),
        ),
        grid_spec=pltpu.PrefetchScalarGridSpec(
            num_scalar_prefetch=0,
            grid=(num_cores, tiles_per_core, col_tiles),
            in_specs=[in_spec, in_spec, in_spec],
            out_specs=(out_spec, out_spec),
        ),
        compiler_params=pltpu.CompilerParams(
            dimension_semantics=("parallel", "arbitrary", "arbitrary"),
        ),
        cost_estimate=cost,
    )(o2, d2, m2)

    # Single tiny (8 KiB per output) cross-lane reduction + sqrt.
    err_sum = jnp.sum(err_p, dtype=jnp.float32)
    cnt_sum = jnp.sum(cnt_p, dtype=jnp.float32)
    return jnp.sqrt(err_sum / cnt_sum)


def _reference(output, depth, mask):
    mf = mask.astype(jnp.float32)
    o = output.astype(jnp.float32)
    d = depth.astype(jnp.float32)
    loss = ((o - d) ** 2 * mf).sum()
    return jnp.sqrt(loss / mf.sum())


if __name__ == "__main__":
    key = jax.random.PRNGKey(0)
    k1, k2, k3 = jax.random.split(key, 3)

    # Depth-prediction-like shapes: (batch, channels, H, W)
    output = jax.random.normal(k1, (2, 4, 16, 16), dtype=jnp.float32)
    depth = jax.random.normal(k2, (2, 4, 16, 16), dtype=jnp.float32)
    mask = jax.random.uniform(k3, (2, 4, 16, 16)) > 0.5    # bool mask (native dtype)

    rmse = jax.block_until_ready(custom_loss(output, depth, mask))
    ref = _reference(output, depth, mask)
    assert jnp.allclose(rmse, ref, rtol=1e-4, atol=1e-5), (rmse, ref)

    # Edge-path coverage at small shapes: partial row tile, one full + one
    # partial column tile, forced 2-core split with a clamped duplicate tile.
    k4, k5, k6 = jax.random.split(jax.random.PRNGKey(1), 3)
    shp = (3, 70, 130)              # rows = 210, cols = 130
    o2 = jax.random.normal(k4, shp, dtype=jnp.float32)
    d2 = jax.random.normal(k5, shp, dtype=jnp.float32)
    m2 = jax.random.uniform(k6, shp) > 0.3
    r2 = jax.block_until_ready(
        custom_loss(o2, d2, m2, max_tile_rows=96, num_cores=2))
    ref2 = _reference(o2, d2, m2)
    assert jnp.allclose(r2, ref2, rtol=1e-4, atol=1e-5), (r2, ref2)

    # bf16 inputs stream in native dtype; accumulation stays f32.
    o3 = o2.astype(jnp.bfloat16)
    d3 = d2.astype(jnp.bfloat16)
    r3 = jax.block_until_ready(custom_loss(o3, d3, m2, max_tile_rows=64))
    ref3 = _reference(o3, d3, m2)
    assert jnp.allclose(r3, ref3, rtol=1e-3, atol=1e-4), (r3, ref3)

    print("KERNEL_OK")
</pallas_src>

<mosaic_0001>
module attributes {stable_mosaic.version = 11 : i64} {
  func.func @_masked_sums_kernel(%arg0: i32, %arg1: i32, %arg2: i32, %arg3: memref<128x128xf32, #tpu.memory_space<vmem>>, %arg4: memref<128x128xf32, #tpu.memory_space<vmem>>, %arg5: memref<128x128xi32, #tpu.memory_space<vmem>>, %arg6: memref<8x128xf32, #tpu.memory_space<vmem>>, %arg7: memref<8x128xf32, #tpu.memory_space<vmem>>) attributes {dimension_semantics = [#tpu.dimension_semantics<parallel>, #tpu.dimension_semantics<arbitrary>, #tpu.dimension_semantics<arbitrary>], iteration_bounds = array<i64: 1, 1, 1>, scalar_prefetch = 0 : i64, scratch_operands = 0 : i64, tpu.core_type = #tpu.core_type<tc>, window_params = [{transform_indices = @transform_0, window_bounds = array<i64: 128, 128>}, {transform_indices = @transform_1, window_bounds = array<i64: 128, 128>}, {transform_indices = @transform_2, window_bounds = array<i64: 128, 128>}, {transform_indices = @transform_3, window_bounds = array<i64: 8, 128>}, {transform_indices = @transform_4, window_bounds = array<i64: 8, 128>}]} {
    %c0_i32 = arith.constant 0 : i32
    %0 = arith.cmpi eq, %arg1, %c0_i32 : i32
    %c0_i32_0 = arith.constant 0 : i32
    %1 = arith.cmpi eq, %arg2, %c0_i32_0 : i32
    %2 = arith.andi %0, %1 : i1
    %3 = arith.extui %2 : i1 to i32
    %c0_i32_1 = arith.constant 0 : i32
    %4 = arith.cmpi ne, %3, %c0_i32_1 : i32
    scf.if %4 {
      %cst_12 = arith.constant 0.000000e+00 : f32
      %24 = vector.broadcast %cst_12 : f32 to vector<8x128xf32>
      %c0_13 = arith.constant 0 : index
      %c0_14 = arith.constant 0 : index
      %25 = vector.load %arg6[%c0_13, %c0_14] : memref<8x128xf32, #tpu.memory_space<vmem>>, vector<8x128xf32>
      tpu.vector_store %arg6[%c0_13, %c0_14], %24 {strides = array<i32>} : memref<8x128xf32, #tpu.memory_space<vmem>>, vector<8x128xf32>,
      %cst_15 = arith.constant 0.000000e+00 : f32
      %26 = vector.broadcast %cst_15 : f32 to vector<8x128xf32>
      %c0_16 = arith.constant 0 : index
      %c0_17 = arith.constant 0 : index
      %27 = vector.load %arg7[%c0_16, %c0_17] : memref<8x128xf32, #tpu.memory_space<vmem>>, vector<8x128xf32>
      tpu.vector_store %arg7[%c0_16, %c0_17], %26 {strides = array<i32>} : memref<8x128xf32, #tpu.memory_space<vmem>>, vector<8x128xf32>,
    } else {
    }
    %c0 = arith.constant 0 : index
    %c0_2 = arith.constant 0 : index
    %5 = vector.load %arg3[%c0, %c0_2] : memref<128x128xf32, #tpu.memory_space<vmem>>, vector<128x128xf32>
    %c0_3 = arith.constant 0 : index
    %c0_4 = arith.constant 0 : index
    %6 = vector.load %arg4[%c0_3, %c0_4] : memref<128x128xf32, #tpu.memory_space<vmem>>, vector<128x128xf32>
    %c0_5 = arith.constant 0 : index
    %c0_6 = arith.constant 0 : index
    %7 = vector.load %arg5[%c0_5, %c0_6] : memref<128x128xi32, #tpu.memory_space<vmem>>, vector<128x128xi32>
    %cst = arith.constant dense<0> : vector<128x128xi32>
    %8 = arith.cmpi ne, %7, %cst : vector<128x128xi32>
    %9 = arith.extui %8 : vector<128x128xi1> to vector<128x128xi32>
    %10 = arith.sitofp %9 : vector<128x128xi32> to vector<128x128xf32>
    %11 = arith.subf %5, %6 : vector<128x128xf32>
    %c1_i32 = arith.constant 1 : i32
    %12 = arith.muli %arg0, %c1_i32 : i32
    %13 = arith.addi %12, %arg1 : i32
    %c128_i32 = arith.constant 128 : i32
    %14 = arith.muli %13, %c128_i32 : i32
    %c128_i32_7 = arith.constant 128 : i32
    %15 = arith.addi %14, %c128_i32_7 : i32
    %c128_i32_8 = arith.constant 128 : i32
    %16 = arith.cmpi sle, %15, %c128_i32_8 : i32
    %c0_i32_9 = arith.constant 0 : i32
    %17 = arith.cmpi slt, %arg2, %c0_i32_9 : i32
    %18 = arith.andi %16, %17 : i1
    %19 = arith.extui %18 : i1 to i32
    %c0_i32_10 = arith.constant 0 : i32
    %20 = arith.cmpi ne, %19, %c0_i32_10 : i32
    scf.if %20 {
      %24 = arith.mulf %11, %11 : vector<128x128xf32>
      %25 = arith.mulf %24, %10 : vector<128x128xf32>
      %c0_12 = arith.constant 0 : index
      %c0_13 = arith.constant 0 : index
      %26 = vector.load %arg6[%c0_12, %c0_13] : memref<8x128xf32, #tpu.memory_space<vmem>>, vector<8x128xf32>
      %27 = vector.shape_cast %25 : vector<128x128xf32> to vector<16x8x128xf32>
      %cst_14 = arith.constant dense<0.000000e+00> : vector<8x128xf32>
      %28 = vector.multi_reduction <add>, %27, %cst_14 [0] : vector<16x8x128xf32> to vector<8x128xf32>
      %29 = arith.addf %26, %28 : vector<8x128xf32>
      %c0_15 = arith.constant 0 : index
      %c0_16 = arith.constant 0 : index
      %30 = vector.load %arg6[%c0_15, %c0_16] : memref<8x128xf32, #tpu.memory_space<vmem>>, vector<8x128xf32>
      tpu.vector_store %arg6[%c0_15, %c0_16], %29 {strides = array<i32>} : memref<8x128xf32, #tpu.memory_space<vmem>>, vector<8x128xf32>,
      %c0_17 = arith.constant 0 : index
      %c0_18 = arith.constant 0 : index
      %31 = vector.load %arg7[%c0_17, %c0_18] : memref<8x128xf32, #tpu.memory_space<vmem>>, vector<8x128xf32>
      %32 = vector.shape_cast %10 : vector<128x128xf32> to vector<16x8x128xf32>
      %cst_19 = arith.constant dense<0.000000e+00> : vector<8x128xf32>
      %33 = vector.multi_reduction <add>, %32, %cst_19 [0] : vector<16x8x128xf32> to vector<8x128xf32>
      %34 = arith.addf %31, %33 : vector<8x128xf32>
      %c0_20 = arith.constant 0 : index
      %c0_21 = arith.constant 0 : index
      %35 = vector.load %arg7[%c0_20, %c0_21] : memref<8x128xf32, #tpu.memory_space<vmem>>, vector<8x128xf32>
      tpu.vector_store %arg7[%c0_20, %c0_21], %34 {strides = array<i32>} : memref<8x128xf32, #tpu.memory_space<vmem>>, vector<8x128xf32>,
    } else {
    }
    %true = arith.constant true
    %21 = arith.xori %18, %true : i1
    %22 = arith.extui %21 : i1 to i32
    %c0_i32_11 = arith.constant 0 : i32
    %23 = arith.cmpi ne, %22, %c0_i32_11 : i32
    scf.if %23 {
      %24 = tpu.iota {dimensions = array<i32: 0>} : vector<128x128xi32>
      %25 = vector.broadcast %14 : i32 to vector<128x128xi32>
      %26 = arith.addi %24, %25 : vector<128x128xi32>
      %27 = tpu.iota {dimensions = array<i32: 1>} : vector<128x128xi32>
      %c128_i32_12 = arith.constant 128 : i32
      %28 = arith.muli %arg2, %c128_i32_12 : i32
      %29 = vector.broadcast %28 : i32 to vector<128x128xi32>
      %30 = arith.addi %27, %29 : vector<128x128xi32>
      %c128_i32_13 = arith.constant 128 : i32
      %31 = vector.broadcast %c128_i32_13 : i32 to vector<128x128xi32>
      %32 = arith.cmpi slt, %26, %31 : vector<128x128xi32>
      %c16_i32 = arith.constant 16 : i32
      %33 = vector.broadcast %c16_i32 : i32 to vector<128x128xi32>
      %34 = arith.cmpi slt, %30, %33 : vector<128x128xi32>
      %35 = arith.andi %32, %34 : vector<128x128xi1>
      %36 = arith.mulf %11, %11 : vector<128x128xf32>
      %37 = arith.mulf %36, %10 : vector<128x128xf32>
      %cst_14 = arith.constant 0.000000e+00 : f32
      %38 = vector.broadcast %cst_14 : f32 to vector<128x128xf32>
      %39 = arith.select %35, %37, %38 : vector<128x128xi1>, vector<128x128xf32>
      %cst_15 = arith.constant 0.000000e+00 : f32
      %40 = vector.broadcast %cst_15 : f32 to vector<128x128xf32>
      %41 = arith.select %35, %10, %40 : vector<128x128xi1>, vector<128x128xf32>
      %c0_16 = arith.constant 0 : index
      %c0_17 = arith.constant 0 : index
      %42 = vector.load %arg6[%c0_16, %c0_17] : memref<8x128xf32, #tpu.memory_space<vmem>>, vector<8x128xf32>
      %43 = vector.shape_cast %39 : vector<128x128xf32> to vector<16x8x128xf32>
      %cst_18 = arith.constant dense<0.000000e+00> : vector<8x128xf32>
      %44 = vector.multi_reduction <add>, %43, %cst_18 [0] : vector<16x8x128xf32> to vector<8x128xf32>
      %45 = arith.addf %42, %44 : vector<8x128xf32>
      %c0_19 = arith.constant 0 : index
      %c0_20 = arith.constant 0 : index
      %46 = vector.load %arg6[%c0_19, %c0_20] : memref<8x128xf32, #tpu.memory_space<vmem>>, vector<8x128xf32>
      tpu.vector_store %arg6[%c0_19, %c0_20], %45 {strides = array<i32>} : memref<8x128xf32, #tpu.memory_space<vmem>>, vector<8x128xf32>,
      %c0_21 = arith.constant 0 : index
      %c0_22 = arith.constant 0 : index
      %47 = vector.load %arg7[%c0_21, %c0_22] : memref<8x128xf32, #tpu.memory_space<vmem>>, vector<8x128xf32>
      %48 = vector.shape_cast %41 : vector<128x128xf32> to vector<16x8x128xf32>
      %cst_23 = arith.constant dense<0.000000e+00> : vector<8x128xf32>
      %49 = vector.multi_reduction <add>, %48, %cst_23 [0] : vector<16x8x128xf32> to vector<8x128xf32>
      %50 = arith.addf %47, %49 : vector<8x128xf32>
      %c0_24 = arith.constant 0 : index
      %c0_25 = arith.constant 0 : index
      %51 = vector.load %arg7[%c0_24, %c0_25] : memref<8x128xf32, #tpu.memory_space<vmem>>, vector<8x128xf32>
      tpu.vector_store %arg7[%c0_24, %c0_25], %50 {strides = array<i32>} : memref<8x128xf32, #tpu.memory_space<vmem>>, vector<8x128xf32>,
    } else {
    }
    return
  }
  func.func @transform_0(%arg0: i32, %arg1: i32, %arg2: i32) -> (i32, i32) {
    %c1_i32 = arith.constant 1 : i32
    %0 = arith.muli %arg0, %c1_i32 : i32
    %1 = arith.addi %0, %arg1 : i32
    %c0_i32 = arith.constant 0 : i32
    %2 = arith.minsi %1, %c0_i32 : i32
    %c0_i32_0 = arith.constant 0 : i32
    return %2, %arg2 : i32, i32
  }
  func.func @transform_1(%arg0: i32, %arg1: i32, %arg2: i32) -> (i32, i32) {
    %c1_i32 = arith.constant 1 : i32
    %0 = arith.muli %arg0, %c1_i32 : i32
    %1 = arith.addi %0, %arg1 : i32
    %c0_i32 = arith.constant 0 : i32
    %2 = arith.minsi %1, %c0_i32 : i32
    %c0_i32_0 = arith.constant 0 : i32
    return %2, %arg2 : i32, i32
  }
  func.func @transform_2(%arg0: i32, %arg1: i32, %arg2: i32) -> (i32, i32) {
    %c1_i32 = arith.constant 1 : i32
    %0 = arith.muli %arg0, %c1_i32 : i32
    %1 = arith.addi %0, %arg1 : i32
    %c0_i32 = arith.constant 0 : i32
    %2 = arith.minsi %1, %c0_i32 : i32
    %c0_i32_0 = arith.constant 0 : i32
    return %2, %arg2 : i32, i32
  }
  func.func @transform_3(%arg0: i32, %arg1: i32, %arg2: i32) -> (i32, i32) {
    %c0_i32 = arith.constant 0 : i32
    %c0_i32_0 = arith.constant 0 : i32
    return %arg0, %c0_i32 : i32, i32
  }
  func.func @transform_4(%arg0: i32, %arg1: i32, %arg2: i32) -> (i32, i32) {
    %c0_i32 = arith.constant 0 : i32
    %c0_i32_0 = arith.constant 0 : i32
    return %arg0, %c0_i32 : i32, i32
  }
}

</mosaic_0001>

<bundles_post_ra>
// kernel: tpu_custom_call.1
= control target key start
LH: loop header
LB: loop body
LE: loop exit
PB: predicated region body
PF: predicated region fallthrough
CT: control target
= control target key end

     0   :  { %10 = vsyncpa [#allocation3], 0  ;;  %v348_v13 = vlaneseq  ;;  %s918_s0 = inlined_call_operand.vmem [shape: f32[128,16], index: 0, kind: input, shape index: {}]   ;;  %s919_s1 = inlined_call_operand.vmem [shape: f32[128,16], index: 1, kind: input, shape index: {}]   ;;  %s920_s2 = inlined_call_operand.vmem [shape: s32[128,16], index: 2, kind: input, shape index: {}]   ;;  %s921_s3 = inlined_call_operand.hbm [shape: f32[8,128], index: 3, kind: output, shape index: {0}]   ;;  %s922_s4 = inlined_call_operand.hbm [shape: f32[8,128], index: 4, kind: output, shape index: {1}]  }
   0x1   :  { %v122_v0 = vld [vmem:[%s918_s0] sm:$0xff]  ;;  %v123_v1 = vld [vmem:[%s918_s0 + $0x8] sm:$0xff]  ;;  %v124_v4 = vld [vmem:[%s918_s0 + $0x10] sm:$0xff] }
   0x2   :  { %v138_v2 = vld [vmem:[%s919_s1] sm:$0xff]  ;;  %v139_v3 = vld [vmem:[%s919_s1 + $0x8] sm:$0xff]  ;;  %v140_v5 = vld [vmem:[%s919_s1 + $0x10] sm:$0xff] }
   0x3   :  { %v154_v6 = vld [vmem:[%s920_s2] sm:$0xff]  ;;  %v155_v7 = vld [vmem:[%s920_s2 + $0x8] sm:$0xff]  ;;  %v125_v8 = vld [vmem:[%s918_s0 + $0x18] sm:$0xff]  ;;  %v218_v9 = vsub.f32 %v122_v0, %v138_v2  ;;  %v219_v10 = vsub.f32 %v123_v1, %v139_v3 }
   0x4   :  { %v141_v11 = vld [vmem:[%s919_s1 + $0x18] sm:$0xff]  ;;  %v156_v12 = vld [vmem:[%s920_s2 + $0x10] sm:$0xff] }
   0x5   :  { %11 = vsyncpa [#allocation5], 0  ;;  %vm170_vm0 = vcmp.ne.s32.totalorder %v154_v6, 0  ;;  %vm171_vm1 = vcmp.ne.s32.totalorder %v155_v7, 0  ;;  %v220_v14 = vsub.f32 %v124_v4, %v140_v5  ;;  %v126_v15 = vld [vmem:[%s918_s0 + $0x20] sm:$0xff]  ;;  %v157_v17 = vld [vmem:[%s920_s2 + $0x18] sm:$0xff]  ;;  %v221_v21 = vsub.f32 %v125_v8, %v141_v11 }
   0x6   :  { %v142_v16 = vld [vmem:[%s919_s1 + $0x20] sm:$0xff]  ;;  %v127_v18 = vld [vmem:[%s918_s0 + $0x28] sm:$0xff]  ;;  %v128_v19 = vld [vmem:[%s918_s0 + $0x30] sm:$0xff]  ;;  %vm172_vm2 = vcmp.ne.s32.totalorder %v156_v12, 0  ;;  %v386_v22 = vmul.f32 %v218_v9, %v218_v9  ;;  %v387_v23 = vmul.f32 %v219_v10, %v219_v10  ;;  %v599_v27 = vmov 0.0   ;;  %s601_s6 = smov [#allocation4]  }
   0x7   :  { %v143_v20 = vld [vmem:[%s919_s1 + $0x28] sm:$0xff]  ;;  %v129_v24 = vld [vmem:[%s918_s0 + $0x38] sm:$0xff]  ;;  %v130_v25 = vld [vmem:[%s918_s0 + $0x40] sm:$0xff]  ;;  %v689_v28 = vsel %vm170_vm0, 1.0, %v599_v27  ;;  %v693_v29 = vsel %vm171_vm1, 1.0, %v599_v27  ;;  %v695_v30 = vand.u32 127, %v348_v13  ;;  %v222_v34 = vsub.f32 %v126_v15, %v142_v16 }
   0x8   :  { %v158_v26 = vld [vmem:[%s920_s2 + $0x20] sm:$0xff]  ;;  %v131_v31 = vld [vmem:[%s918_s0 + $0x48] sm:$0xff]  ;;  %v144_v32 = vld [vmem:[%s919_s1 + $0x30] sm:$0xff]  ;;  %vm173_vm3 = vcmp.ne.s32.totalorder %v157_v17, 0  ;;  %v388_v35 = vmul.f32 %v220_v14, %v220_v14  ;;  %v717_v39 = vsel %vm172_vm2, 1.0, %v599_v27  ;;  %v223_v40 = vsub.f32 %v127_v18, %v143_v20  ;;  %s502_s7 = sshll.u32 %s601_s6, 4  ;;  %s503_s7 = int_to_ptr.vmem [resolvable:$true] %s502_s7 }
   0x9   :  { %v145_v33 = vld [vmem:[%s919_s1 + $0x38] sm:$0xff]  ;;  %v132_v36 = vld [vmem:[%s918_s0 + $0x50] sm:$0xff]  ;;  %v146_v37 = vld [vmem:[%s919_s1 + $0x40] sm:$0xff]  ;;  %vm174_vm4 = vcmp.ne.s32.totalorder %v158_v26, 0  ;;  %v389_v44 = vmul.f32 %v221_v21, %v221_v21  ;;  %v402_v45 = vmul.f32 %v689_v28, %v386_v22  ;;  %v403_v46 = vmul.f32 %v693_v29, %v387_v23 }
   0xa   :  { %v159_v38 = vld [vmem:[%s920_s2 + $0x28] sm:$0xff]  ;;  %v148_v42 = vld [vmem:[%s919_s1 + $0x50] sm:$0xff]  ;;  %v133_v47 = vld [vmem:[%s918_s0 + $0x58] sm:$0xff]  ;;  %v741_v50 = vsel %vm173_vm3, 1.0, %v599_v27  ;;  %v224_v51 = vsub.f32 %v128_v19, %v144_v32  ;;  %v225_v52 = vsub.f32 %v129_v24, %v145_v33  ;;  %vm369_vm5 = vcmp.lt.s32.totalorder %v695_v30, 16 }
   0xb   :  { %v147_v41 = vld [vmem:[%s919_s1 + $0x48] sm:$0xff]  ;;  %v160_v43 = vld [vmem:[%s920_s2 + $0x30] sm:$0xff]  ;;  %v134_v48 = vld [vmem:[%s918_s0 + $0x60] sm:$0xff]  ;;  %vm175_vm6 = vcmp.ne.s32.totalorder %v159_v38, 0  ;;  %v226_v56 = vsub.f32 %v130_v25, %v146_v37  ;;  %v390_v57 = vmul.f32 %v222_v34, %v222_v34  ;;  %v404_v58 = vmul.f32 %v717_v39, %v388_v35 }
   0xc   :  { %v135_v49 = vld [vmem:[%s918_s0 + $0x68] sm:$0xff]  ;;  %v149_v53 = vld [vmem:[%s919_s1 + $0x58] sm:$0xff]  ;;  %v150_v54 = vld [vmem:[%s919_s1 + $0x60] sm:$0xff]  ;;  %vm176_vm7 = vcmp.ne.s32.totalorder %v160_v43, 0  ;;  %v536_v61 = vsel %vm174_vm4, 1.0, %v599_v27  ;;  %v227_v62 = vsub.f32 %v131_v31, %v147_v41  ;;  %v228_v63 = vsub.f32 %v132_v36, %v148_v42 }
   0xd   :  { %v151_v55 = vld [vmem:[%s919_s1 + $0x68] sm:$0xff]  ;;  %v136_v59 = vld [vmem:[%s918_s0 + $0x70] sm:$0xff]  ;;  %v161_v60 = vld [vmem:[%s920_s2 + $0x38] sm:$0xff]  ;;  %v391_v3 = vmul.f32 %v223_v40, %v223_v40  ;;  %v405_v4 = vmul.f32 %v741_v50, %v389_v44  ;;  %v418_v5 = vsel %vm369_vm5, %v402_v45, 0.0  ;;  %v419_v6 = vsel %vm369_vm5, %v403_v46, 0.0 }
   0xe   :  { %v137_v0 = vld [vmem:[%s918_s0 + $0x78] sm:$0xff]  ;;  %v152_v1 = vld [vmem:[%s919_s1 + $0x70] sm:$0xff]  ;;  %v162_v7 = vld [vmem:[%s920_s2 + $0x40] sm:$0xff]  ;;  %v537_v8 = vsel %vm175_vm6, 1.0, %v599_v27  ;;  %v229_v9 = vsub.f32 %v133_v47, %v149_v53  ;;  %v230_v10 = vsub.f32 %v134_v48, %v150_v54  ;;  %v781_v11 = vsub.f32 %v135_v49, %v151_v55 }
   0xf   :  { %v153_v2 = vld [vmem:[%s919_s1 + $0x78] sm:$0xff]  ;;  %vm177_vm8 = vcmp.ne.s32.totalorder %v161_v60, 0  ;;  %v392_v12 = vmul.f32 %v224_v51, %v224_v51  ;;  %v406_v13 = vmul.f32 %v536_v61, %v390_v57  ;;  %v420_v14 = vsel %vm369_vm5, %v404_v58, 0.0  ;;  %v163_v15 = vld [vmem:[%s920_s2 + $0x48] sm:$0xff]  ;;  %v164_v20 = vld [vmem:[%s920_s2 + $0x50] sm:$0xff] }
  0x10   :  { %v538_v16 = vsel %vm176_vm7, 1.0, %v599_v27  ;;  %v790_v17 = vsub.f32 %v136_v59, %v152_v1  ;;  %v792_v18 = vsub.f32 %v137_v0, %v153_v2  ;;  %v451_v19 = vadd.f32 %v419_v6, %v418_v5  ;;  %v165_v32 = vld [vmem:[%s920_s2 + $0x58] sm:$0xff] }
  0x11   :  { %vm178_vm9 = vcmp.ne.s32.totalorder %v162_v7, 0  ;;  %v393_v21 = vmul.f32 %v225_v52, %v225_v52  ;;  %v407_v22 = vmul.f32 %v537_v8, %v391_v3  ;;  %v421_v23 = vsel %vm369_vm5, %v405_v4, 0.0 }
  0x12   :  { %v539_v24 = vsel %vm177_vm8, 1.0, %v599_v27  ;;  %v452_v25 = vadd.f32 %v451_v19, %v420_v14  ;;  %v434_v26 = vsel %vm369_vm5, %v689_v28, 0.0  ;;  %v435_v31 = vsel %vm369_vm5, %v693_v29, 0.0  ;;  %v166_v29 = vld [vmem:[%s920_s2 + $0x60] sm:$0xff] }
  0x13   :  { %vm179_vm10 = vcmp.ne.s32.totalorder %v163_v15, 0  ;;  %v394_v33 = vmul.f32 %v226_v56, %v226_v56  ;;  %v408_v34 = vmul.f32 %v538_v16, %v392_v12  ;;  %v422_v35 = vsel %vm369_vm5, %v406_v13, 0.0 }
  0x14   :  { %vm180_vm11 = vcmp.ne.s32.totalorder %v164_v20, 0  ;;  %v540_v36 = vsel %vm178_vm9, 1.0, %v599_v27  ;;  %v453_v37 = vadd.f32 %v452_v25, %v421_v23  ;;  %v436_v28 = vsel %vm369_vm5, %v717_v39, 0.0  ;;  %v167_v39 = vld [vmem:[%s920_s2 + $0x68] sm:$0xff] }
  0x15   :  { %v395_v38 = vmul.f32 %v227_v62, %v227_v62  ;;  %v409_v40 = vmul.f32 %v539_v24, %v393_v21  ;;  %v423_v41 = vsel %vm369_vm5, %v407_v22, 0.0  ;;  %v469_v42 = vadd.f32 %v435_v31, %v434_v26 }
  0x16   :  { %vm181_vm12 = vcmp.ne.s32.totalorder %v165_v32, 0  ;;  %v541_v43 = vsel %vm179_vm10, 1.0, %v599_v27  ;;  %v454_v44 = vadd.f32 %v453_v37, %v422_v35  ;;  %v437_v45 = vsel %vm369_vm5, %v741_v50, 0.0  ;;  %v168_v50 = vld [vmem:[%s920_s2 + $0x70] sm:$0xff] }
  0x17   :  { %v396_v46 = vmul.f32 %v228_v63, %v228_v63  ;;  %v410_v47 = vmul.f32 %v540_v36, %v394_v33  ;;  %v424_v48 = vsel %vm369_vm5, %v408_v34, 0.0  ;;  %v470_v49 = vadd.f32 %v469_v42, %v436_v28 }
  0x18   :  { %vm182_vm13 = vcmp.ne.s32.totalorder %v166_v29, 0  ;;  %v542_v51 = vsel %vm180_vm11, 1.0, %v599_v27  ;;  %v455_v52 = vadd.f32 %v454_v44, %v423_v41  ;;  %v438_v53 = vsel %vm369_vm5, %v536_v61, 0.0  ;;  %v169_v61 = vld [vmem:[%s920_s2 + $0x78] sm:$0xff]  ;;  %s600_s2 = smov [#allocation2]  }
  0x19   :  { %v397_v54 = vmul.f32 %v229_v9, %v229_v9  ;;  %v411_v55 = vmul.f32 %v541_v43, %v395_v38  ;;  %v425_v56 = vsel %vm369_vm5, %v409_v40, 0.0  ;;  %v471_v57 = vadd.f32 %v470_v49, %v437_v45  ;;  %s492_s5 = sshll.u32 %s600_s2, 4  ;;  %s493_s5 = int_to_ptr.vmem [resolvable:$true] %s492_s5 }
  0x1a   :  { %vm183_vm14 = vcmp.ne.s32.totalorder %v167_v39, 0  ;;  %v543_v58 = vsel %vm181_vm12, 1.0, %v599_v27  ;;  %v456_v59 = vadd.f32 %v455_v52, %v424_v48  ;;  %v439_v60 = vsel %vm369_vm5, %v537_v8, 0.0  ;;  %s551_s8 = scalar_lea.vmem %s493_s5, 128  ;;  %p556_p1 = scmp.lt.s32.totalorder %s493_s5, %s493_s5 }
  0x1b   :  { %v398_v62 = vmul.f32 %v230_v10, %v230_v10  ;;  %v412_v63 = vmul.f32 %v542_v51, %v396_v46  ;;  %v426_v0 = vsel %vm369_vm5, %v410_v47, 0.0  ;;  %v472_v1 = vadd.f32 %v471_v57, %v438_v53  ;;  %p552_p0 = scmp.ne.s32.totalorder %s493_s5, %s551_s8  ;;  %p557_p2 = scmp.lt.s32.totalorder %s551_s8, %s551_s8 }
  0x1c   :  { %vm184_vm15 = vcmp.ne.s32.totalorder %v168_v50, 0  ;;  %v544_v2 = vsel %vm182_vm13, 1.0, %v599_v27  ;;  %v457_v3 = vadd.f32 %v456_v59, %v425_v56  ;;  %v440_v4 = vsel %vm369_vm5, %v538_v16, 0.0 }
  0x1d   :  { %v399_v5 = vmul.f32 %v781_v11, %v781_v11  ;;  %v413_v6 = vmul.f32 %v543_v58, %v397_v54  ;;  %v427_v7 = vsel %vm369_vm5, %v411_v55, 0.0  ;;  %v473_v8 = vadd.f32 %v472_v1, %v439_v60  ;;  %p558_p3 = por %p557_p2, %p556_p1 }
  0x1e   :  { %vm185_vm0 = vcmp.ne.s32.totalorder %v169_v61, 0  ;;  %v545_v9 = vsel %vm183_vm14, 1.0, %v599_v27  ;;  %v458_v10 = vadd.f32 %v457_v3, %v426_v0  ;;  %v441_v12 = vsel %vm369_vm5, %v539_v24, 0.0 }
  0x1f   :  { %v400_v13 = vmul.f32 %v790_v17, %v790_v17  ;;  %v414_v14 = vmul.f32 %v544_v2, %v398_v62  ;;  %v428_v11 = vsel %vm369_vm5, %v412_v63, 0.0  ;;  %v474_v15 = vadd.f32 %v473_v8, %v440_v4  ;;  %p559_p4 = pnand %p558_p3, %p552_p0 }
  0x20   :  { %v546_v16 = vsel %vm184_vm15, 1.0, %v599_v27  ;;  %v459_v19 = vadd.f32 %v458_v10, %v427_v7  ;;  %v442_v20 = vsel %vm369_vm5, %v540_v36, 0.0  ;;  %v401_v21 = vmul.f32 %v792_v18, %v792_v18 }
  0x21   :  { %v415_v22 = vmul.f32 %v545_v9, %v399_v5  ;;  %v429_v23 = vsel %vm369_vm5, %v413_v6, 0.0  ;;  %v475_v17 = vadd.f32 %v474_v15, %v441_v12  ;;  %v547_v24 = vsel %vm185_vm0, 1.0, %v599_v27 }
  0x22   :  { %v460_v25 = vadd.f32 %v459_v19, %v428_v11  ;;  %v443_v26 = vsel %vm369_vm5, %v541_v43, 0.0  ;;  %v416_v31 = vmul.f32 %v546_v16, %v400_v13  ;;  %v430_v32 = vsel %vm369_vm5, %v414_v14, 0.0 }
  0x23   :  { %v476_v33 = vadd.f32 %v475_v17, %v442_v20  ;;  %v444_v18 = vsel %vm369_vm5, %v542_v51, 0.0  ;;  %v417_v35 = vmul.f32 %v547_v24, %v401_v21  ;;  %v431_v36 = vsel %vm369_vm5, %v415_v22, 0.0 }
  0x24   :  { %v461_v34 = vadd.f32 %v460_v25, %v429_v23  ;;  %v445_v27 = vsel %vm369_vm5, %v543_v58, 0.0  ;;  %v432_v29 = vsel %vm369_vm5, %v416_v31, 0.0  ;;  %v446_v41 = vsel %vm369_vm5, %v544_v2, 0.0 }
  0x25   :  { %v477_v37 = vadd.f32 %v476_v33, %v443_v26  ;;  %v433_v42 = vsel %vm369_vm5, %v417_v35, 0.0  ;;  %v447_v45 = vsel %vm369_vm5, %v545_v9, 0.0  ;;  %v448_v47 = vsel %vm369_vm5, %v546_v16, 0.0 }
  0x26   :  { %v462_v28 = vadd.f32 %v461_v34, %v430_v32  ;;  %v449_v49 = vsel %vm369_vm5, %v547_v24, 0.0 }
  0x27   :  { %v478_v38 = vadd.f32 %v477_v37, %v444_v18 }
  0x28   :  { %v463_v40 = vadd.f32 %v462_v28, %v431_v36 }
  0x29   :  { %v479_v43 = vadd.f32 %v478_v38, %v445_v27 }
  0x2a   :  { %v464_v44 = vadd.f32 %v463_v40, %v432_v29 }
  0x2b   :  { %v480_v39 = vadd.f32 %v479_v43, %v446_v41 }
  0x2c   :  { %v465_v46 = vadd.f32 %v464_v44, %v433_v42 }
  0x2d   :  { %v481_v48 = vadd.f32 %v480_v39, %v447_v45 }
  0x2e   :  { %467 = vst [vmem:[#allocation2] sm:$0xff] %v465_v46 }
  0x2f   :  { %v482_v51 = vadd.f32 %v481_v48, %v448_v47 }
  0x31   :  { %v483_v52 = vadd.f32 %v482_v51, %v449_v49 }
  0x32   :  { %562 = shalt.err (!%p559_p4)
}
  0x33   :  { %s563_s11 = scalar_lea.hbm %s921_s3, 128 }
  0x34   :  { %p564_p5 = scmp.ne.s32.totalorder %s921_s3, %s563_s11  ;;  %p567_p6 = scmp.lt.u32.totalorder %s563_s11, %s921_s3 }
  0x36   :  { %p569_p7 = pnand %p567_p6, %p564_p5 }
  0x38   :  { %572 = shalt.err (!%p569_p7)
}
  0x39   :  { %495 = dma.vmem_to_hbm [thread:$0]  %s493_s5, 128, %s921_s3, [#allocation3]   ;;  %485 = vst [vmem:[#allocation4] sm:$0xff] %v483_v52 }
  0x3a   :  { %s573_s18 = scalar_lea.vmem %s503_s7, 128  ;;  %p578_p9 = scmp.lt.s32.totalorder %s503_s7, %s503_s7 }
  0x3b   :  { %p574_p8 = scmp.ne.s32.totalorder %s503_s7, %s573_s18  ;;  %p579_p10 = scmp.lt.s32.totalorder %s573_s18, %s573_s18 }
  0x3d   :  { %p580_p11 = por %p579_p10, %p578_p9 }
  0x3f   :  { %p581_p12 = pnand %p580_p11, %p574_p8 }
  0x41   :  { %584 = shalt.err (!%p581_p12)
}
  0x42   :  { %s585_s19 = scalar_lea.hbm %s922_s4, 128 }
  0x43   :  { %p586_p13 = scmp.ne.s32.totalorder %s922_s4, %s585_s19  ;;  %p589_p0 = scmp.lt.u32.totalorder %s585_s19, %s922_s4 }
  0x45   :  { %p591_p1 = pnand %p589_p0, %p586_p13 }
  0x47   :  { %594 = shalt.err (!%p591_p1)
}
  0x48   :  { %505 = dma.vmem_to_hbm [thread:$0]  %s503_s7, 128, %s922_s4, [#allocation5]  }
  0x49   :  { %595 = dma.done.wait [#allocation3], 128  }
  0x4a   :  { %596 = vsyncadd [#allocation3], 4294967168 }
  0x4b   :  { %597 = dma.done.wait [#allocation5], 128  }
  0x4c   :  { %598 = vsyncadd [#allocation5], 4294967168 }
  0x4d   :  { %512 = vsyncpa [#allocation3], 1 }
  0x4e   :  { %513 = vsyncpa [#allocation5], 1 }

</bundles_post_ra>
